<compile_context>
chip_gen: v5e
topology: v5e:2x2
jax: 0.10.0
libtpu: 0.0.40
codegen_flags: <defaults>
</compile_context>

<pallas_src>
import numpy as np
import jax
import jax.numpy as jnp
from jax import lax
from jax.experimental import pallas as pl
from jax.experimental.pallas import tpu as pltpu


def _build_positional_table(max_seq_len: int, d_model: int) -> np.ndarray:
    """Deterministic sinusoidal table, exactly as PositionalEncoding.__init__."""
    posencoding = np.array(
        [
            [t / np.power(10000, 2.0 * (d // 2) / d_model) for d in range(d_model)]
            for t in range(1, 1 + max_seq_len)
        ]
    )
    posencoding[:, 0::2] = np.sin(posencoding[:, 0::2])
    posencoding[:, 1::2] = np.cos(posencoding[:, 1::2])
    # Row 0 is all zeros (the padding index), matching torch.cat((zeros, pos)).
    table = np.concatenate([np.zeros([1, d_model]), posencoding], axis=0)
    return table.astype(np.float32)


def _gather_block_kernel(ids_ref, table_ref, out_ref):
    # ids_ref   : (N_pad,) int32 in SMEM (scalar prefetch) -- token -> table-row ids.
    # table_ref : (V, D) float32 in VMEM -- the whole table, resident across the grid.
    # out_ref   : (T, D) float32 -- output block for this group of T tokens.
    T = out_ref.shape[0]
    V = table_ref.shape[0]
    base = pl.program_id(0) * T

    def body(r, carry):
        row = ids_ref[base + r]
        # Clamp like jnp.take (torch.nn.Embedding would raise on OOB; indices here
        # are always in-range, the clamp just keeps any bad index from faulting).
        row = jnp.minimum(jnp.maximum(row, 0), V - 1)
        out_ref[pl.ds(r, 1), :] = table_ref[pl.ds(row, 1), :]
        return carry

    # Short fixed trip count -> unroll for LLO scheduler visibility; cap unroll for
    # large token blocks so compile time stays bounded.
    unroll = True if T <= 64 else 8
    lax.fori_loop(0, T, body, 0, unroll=unroll)


def positional_encoding(x_idx: jax.Array, table: jax.Array, *, block_tokens: int = 256) -> jax.Array:
    """x_idx: [B, S] int32; table: [V, D] float32 -> [B, S, D] float32."""
    B, S = x_idx.shape
    V, D = table.shape
    N = B * S

    # Token-block size: multiple of 8 (sublane-dense output blocks), capped at block_tokens.
    T = min(block_tokens, pl.cdiv(N, 8) * 8)
    T = max(8, (T // 8) * 8)
    num_blocks = pl.cdiv(N, T)
    N_pad = num_blocks * T

    ids = x_idx.reshape(N).astype(jnp.int32)
    if N_pad != N:
        # Pad with 0 (the zero row); padded outputs are sliced off below.
        ids = jnp.pad(ids, (0, N_pad - N))

    itemsize = jnp.dtype(table.dtype).itemsize
    table_bytes = V * D * itemsize
    out_block_bytes = T * D * itemsize

    grid_spec = pltpu.PrefetchScalarGridSpec(
        num_scalar_prefetch=1,
        grid=(num_blocks,),
        in_specs=[
            # Whole table resident in VMEM: constant block index across the grid,
            # so it is DMA'd from HBM only once.
            pl.BlockSpec((V, D), lambda i, ids_ref: (0, 0)),
        ],
        out_specs=pl.BlockSpec((T, D), lambda i, ids_ref: (i, 0)),
    )

    # Budget: resident table + double-buffered output blocks (+ headroom). Only raise
    # the scoped VMEM limit if the default (16 MiB on v5e) would be exceeded.
    vmem_needed = table_bytes + 2 * out_block_bytes + (1 << 20)
    vmem_limit = min(vmem_needed, 128 << 20) if vmem_needed > (16 << 20) else None
    # TODO(synk): if the table itself approaches the v7x 64 MiB VMEM, add a grid axis
    # tiling D rather than falling back to per-row HBM gathers.

    out_flat = pl.pallas_call(
        _gather_block_kernel,
        out_shape=jax.ShapeDtypeStruct((N_pad, D), table.dtype),
        grid_spec=grid_spec,
        compiler_params=pltpu.CompilerParams(
            dimension_semantics=("parallel",),
            vmem_limit_bytes=vmem_limit,
        ),
        cost_estimate=pl.CostEstimate(
            flops=0,
            transcendentals=0,
            # table read once + output written + indices read
            bytes_accessed=table_bytes + N_pad * D * itemsize + N_pad * 4,
        ),
    )(ids, table)

    return out_flat[:N].reshape(B, S, D)


if __name__ == "__main__":
    max_seq_len = 8
    d_model = 32
    batch = 2

    # Deterministic "parameters" (the fixed, non-trainable embedding table).
    table = jnp.asarray(_build_positional_table(max_seq_len, d_model))

    # Deterministic example input: integer positions in [0, max_seq_len],
    # shape [B, max_seq_len] (0 acts as padding -> zero row of the table).
    key = jax.random.PRNGKey(0)
    x_idx = jax.random.randint(
        key, (batch, max_seq_len), minval=0, maxval=max_seq_len + 1, dtype=jnp.int32
    )

    out = positional_encoding(x_idx, table)
    out = jax.block_until_ready(out)

    # Pure-JAX reference of the PyTorch forward: posembedding(x) == table[x].
    ref = jnp.take(table, x_idx, axis=0)
    assert out.shape == (batch, max_seq_len, d_model)
    np.testing.assert_allclose(np.asarray(out), np.asarray(ref), rtol=1e-6, atol=1e-6)

    print("KERNEL_OK")
</pallas_src>

<mosaic_0001>
module attributes {stable_mosaic.version = 11 : i64} {
  func.func @_gather_block_kernel(%arg0: i32, %arg1: memref<16xi32, #tpu.memory_space<smem>>, %arg2: memref<9x32xf32, #tpu.memory_space<vmem>>, %arg3: memref<16x32xf32, #tpu.memory_space<vmem>>) attributes {dimension_semantics = [#tpu.dimension_semantics<parallel>], iteration_bounds = array<i64: 1>, scalar_prefetch = 1 : i64, scratch_operands = 0 : i64, tpu.core_type = #tpu.core_type<tc>, window_params = [{pipeline_mode = #tpu.pipeline_mode<synchronous>, transform_indices = @transform_0, window_bounds = array<i64: 9, 32>}, {transform_indices = @transform_1, window_bounds = array<i64: 16, 32>}]} {
    %c16_i32 = arith.constant 16 : i32
    %0 = arith.muli %arg0, %c16_i32 : i32
    %c0_i32 = arith.constant 0 : i32
    %1 = arith.addi %0, %c0_i32 : i32
    %2 = arith.index_cast %1 : i32 to index
    %3 = memref.load %arg1[%2] : memref<16xi32, #tpu.memory_space<smem>>
    %c0_i32_0 = arith.constant 0 : i32
    %4 = arith.maxsi %3, %c0_i32_0 : i32
    %c8_i32 = arith.constant 8 : i32
    %5 = arith.minsi %4, %c8_i32 : i32
    %6 = arith.index_cast %5 : i32 to index
    %c0 = arith.constant 0 : index
    %7 = vector.load %arg2[%6, %c0] : memref<9x32xf32, #tpu.memory_space<vmem>>, vector<1x32xf32>
    %8 = arith.index_cast %c0_i32 : i32 to index
    %c0_1 = arith.constant 0 : index
    %9 = vector.load %arg3[%8, %c0_1] : memref<16x32xf32, #tpu.memory_space<vmem>>, vector<1x32xf32>
    tpu.vector_store %arg3[%8, %c0_1], %7 {strides = array<i32>} : memref<16x32xf32, #tpu.memory_space<vmem>>, vector<1x32xf32>,
    %c1_i32 = arith.constant 1 : i32
    %10 = arith.addi %0, %c1_i32 : i32
    %11 = arith.index_cast %10 : i32 to index
    %12 = memref.load %arg1[%11] : memref<16xi32, #tpu.memory_space<smem>>
    %c0_i32_2 = arith.constant 0 : i32
    %13 = arith.maxsi %12, %c0_i32_2 : i32
    %c8_i32_3 = arith.constant 8 : i32
    %14 = arith.minsi %13, %c8_i32_3 : i32
    %15 = arith.index_cast %14 : i32 to index
    %c0_4 = arith.constant 0 : index
    %16 = vector.load %arg2[%15, %c0_4] : memref<9x32xf32, #tpu.memory_space<vmem>>, vector<1x32xf32>
    %17 = arith.index_cast %c1_i32 : i32 to index
    %c0_5 = arith.constant 0 : index
    %18 = vector.load %arg3[%17, %c0_5] : memref<16x32xf32, #tpu.memory_space<vmem>>, vector<1x32xf32>
    tpu.vector_store %arg3[%17, %c0_5], %16 {strides = array<i32>} : memref<16x32xf32, #tpu.memory_space<vmem>>, vector<1x32xf32>,
    %c2_i32 = arith.constant 2 : i32
    %19 = arith.addi %0, %c2_i32 : i32
    %20 = arith.index_cast %19 : i32 to index
    %21 = memref.load %arg1[%20] : memref<16xi32, #tpu.memory_space<smem>>
    %c0_i32_6 = arith.constant 0 : i32
    %22 = arith.maxsi %21, %c0_i32_6 : i32
    %c8_i32_7 = arith.constant 8 : i32
    %23 = arith.minsi %22, %c8_i32_7 : i32
    %24 = arith.index_cast %23 : i32 to index
    %c0_8 = arith.constant 0 : index
    %25 = vector.load %arg2[%24, %c0_8] : memref<9x32xf32, #tpu.memory_space<vmem>>, vector<1x32xf32>
    %26 = arith.index_cast %c2_i32 : i32 to index
    %c0_9 = arith.constant 0 : index
    %27 = vector.load %arg3[%26, %c0_9] : memref<16x32xf32, #tpu.memory_space<vmem>>, vector<1x32xf32>
    tpu.vector_store %arg3[%26, %c0_9], %25 {strides = array<i32>} : memref<16x32xf32, #tpu.memory_space<vmem>>, vector<1x32xf32>,
    %c3_i32 = arith.constant 3 : i32
    %28 = arith.addi %0, %c3_i32 : i32
    %29 = arith.index_cast %28 : i32 to index
    %30 = memref.load %arg1[%29] : memref<16xi32, #tpu.memory_space<smem>>
    %c0_i32_10 = arith.constant 0 : i32
    %31 = arith.maxsi %30, %c0_i32_10 : i32
    %c8_i32_11 = arith.constant 8 : i32
    %32 = arith.minsi %31, %c8_i32_11 : i32
    %33 = arith.index_cast %32 : i32 to index
    %c0_12 = arith.constant 0 : index
    %34 = vector.load %arg2[%33, %c0_12] : memref<9x32xf32, #tpu.memory_space<vmem>>, vector<1x32xf32>
    %35 = arith.index_cast %c3_i32 : i32 to index
    %c0_13 = arith.constant 0 : index
    %36 = vector.load %arg3[%35, %c0_13] : memref<16x32xf32, #tpu.memory_space<vmem>>, vector<1x32xf32>
    tpu.vector_store %arg3[%35, %c0_13], %34 {strides = array<i32>} : memref<16x32xf32, #tpu.memory_space<vmem>>, vector<1x32xf32>,
    %c4_i32 = arith.constant 4 : i32
    %37 = arith.addi %0, %c4_i32 : i32
    %38 = arith.index_cast %37 : i32 to index
    %39 = memref.load %arg1[%38] : memref<16xi32, #tpu.memory_space<smem>>
    %c0_i32_14 = arith.constant 0 : i32
    %40 = arith.maxsi %39, %c0_i32_14 : i32
    %c8_i32_15 = arith.constant 8 : i32
    %41 = arith.minsi %40, %c8_i32_15 : i32
    %42 = arith.index_cast %41 : i32 to index
    %c0_16 = arith.constant 0 : index
    %43 = vector.load %arg2[%42, %c0_16] : memref<9x32xf32, #tpu.memory_space<vmem>>, vector<1x32xf32>
    %44 = arith.index_cast %c4_i32 : i32 to index
    %c0_17 = arith.constant 0 : index
    %45 = vector.load %arg3[%44, %c0_17] : memref<16x32xf32, #tpu.memory_space<vmem>>, vector<1x32xf32>
    tpu.vector_store %arg3[%44, %c0_17], %43 {strides = array<i32>} : memref<16x32xf32, #tpu.memory_space<vmem>>, vector<1x32xf32>,
    %c5_i32 = arith.constant 5 : i32
    %46 = arith.addi %0, %c5_i32 : i32
    %47 = arith.index_cast %46 : i32 to index
    %48 = memref.load %arg1[%47] : memref<16xi32, #tpu.memory_space<smem>>
    %c0_i32_18 = arith.constant 0 : i32
    %49 = arith.maxsi %48, %c0_i32_18 : i32
    %c8_i32_19 = arith.constant 8 : i32
    %50 = arith.minsi %49, %c8_i32_19 : i32
    %51 = arith.index_cast %50 : i32 to index
    %c0_20 = arith.constant 0 : index
    %52 = vector.load %arg2[%51, %c0_20] : memref<9x32xf32, #tpu.memory_space<vmem>>, vector<1x32xf32>
    %53 = arith.index_cast %c5_i32 : i32 to index
    %c0_21 = arith.constant 0 : index
    %54 = vector.load %arg3[%53, %c0_21] : memref<16x32xf32, #tpu.memory_space<vmem>>, vector<1x32xf32>
    tpu.vector_store %arg3[%53, %c0_21], %52 {strides = array<i32>} : memref<16x32xf32, #tpu.memory_space<vmem>>, vector<1x32xf32>,
    %c6_i32 = arith.constant 6 : i32
    %55 = arith.addi %0, %c6_i32 : i32
    %56 = arith.index_cast %55 : i32 to index
    %57 = memref.load %arg1[%56] : memref<16xi32, #tpu.memory_space<smem>>
    %c0_i32_22 = arith.constant 0 : i32
    %58 = arith.maxsi %57, %c0_i32_22 : i32
    %c8_i32_23 = arith.constant 8 : i32
    %59 = arith.minsi %58, %c8_i32_23 : i32
    %60 = arith.index_cast %59 : i32 to index
    %c0_24 = arith.constant 0 : index
    %61 = vector.load %arg2[%60, %c0_24] : memref<9x32xf32, #tpu.memory_space<vmem>>, vector<1x32xf32>
    %62 = arith.index_cast %c6_i32 : i32 to index
    %c0_25 = arith.constant 0 : index
    %63 = vector.load %arg3[%62, %c0_25] : memref<16x32xf32, #tpu.memory_space<vmem>>, vector<1x32xf32>
    tpu.vector_store %arg3[%62, %c0_25], %61 {strides = array<i32>} : memref<16x32xf32, #tpu.memory_space<vmem>>, vector<1x32xf32>,
    %c7_i32 = arith.constant 7 : i32
    %64 = arith.addi %0, %c7_i32 : i32
    %65 = arith.index_cast %64 : i32 to index
    %66 = memref.load %arg1[%65] : memref<16xi32, #tpu.memory_space<smem>>
    %c0_i32_26 = arith.constant 0 : i32
    %67 = arith.maxsi %66, %c0_i32_26 : i32
    %c8_i32_27 = arith.constant 8 : i32
    %68 = arith.minsi %67, %c8_i32_27 : i32
    %69 = arith.index_cast %68 : i32 to index
    %c0_28 = arith.constant 0 : index
    %70 = vector.load %arg2[%69, %c0_28] : memref<9x32xf32, #tpu.memory_space<vmem>>, vector<1x32xf32>
    %71 = arith.index_cast %c7_i32 : i32 to index
    %c0_29 = arith.constant 0 : index
    %72 = vector.load %arg3[%71, %c0_29] : memref<16x32xf32, #tpu.memory_space<vmem>>, vector<1x32xf32>
    tpu.vector_store %arg3[%71, %c0_29], %70 {strides = array<i32>} : memref<16x32xf32, #tpu.memory_space<vmem>>, vector<1x32xf32>,
    %c8_i32_30 = arith.constant 8 : i32
    %73 = arith.addi %0, %c8_i32_30 : i32
    %74 = arith.index_cast %73 : i32 to index
    %75 = memref.load %arg1[%74] : memref<16xi32, #tpu.memory_space<smem>>
    %c0_i32_31 = arith.constant 0 : i32
    %76 = arith.maxsi %75, %c0_i32_31 : i32
    %c8_i32_32 = arith.constant 8 : i32
    %77 = arith.minsi %76, %c8_i32_32 : i32
    %78 = arith.index_cast %77 : i32 to index
    %c0_33 = arith.constant 0 : index
    %79 = vector.load %arg2[%78, %c0_33] : memref<9x32xf32, #tpu.memory_space<vmem>>, vector<1x32xf32>
    %80 = arith.index_cast %c8_i32_30 : i32 to index
    %c0_34 = arith.constant 0 : index
    %81 = vector.load %arg3[%80, %c0_34] : memref<16x32xf32, #tpu.memory_space<vmem>>, vector<1x32xf32>
    tpu.vector_store %arg3[%80, %c0_34], %79 {strides = array<i32>} : memref<16x32xf32, #tpu.memory_space<vmem>>, vector<1x32xf32>,
    %c9_i32 = arith.constant 9 : i32
    %82 = arith.addi %0, %c9_i32 : i32
    %83 = arith.index_cast %82 : i32 to index
    %84 = memref.load %arg1[%83] : memref<16xi32, #tpu.memory_space<smem>>
    %c0_i32_35 = arith.constant 0 : i32
    %85 = arith.maxsi %84, %c0_i32_35 : i32
    %c8_i32_36 = arith.constant 8 : i32
    %86 = arith.minsi %85, %c8_i32_36 : i32
    %87 = arith.index_cast %86 : i32 to index
    %c0_37 = arith.constant 0 : index
    %88 = vector.load %arg2[%87, %c0_37] : memref<9x32xf32, #tpu.memory_space<vmem>>, vector<1x32xf32>
    %89 = arith.index_cast %c9_i32 : i32 to index
    %c0_38 = arith.constant 0 : index
    %90 = vector.load %arg3[%89, %c0_38] : memref<16x32xf32, #tpu.memory_space<vmem>>, vector<1x32xf32>
    tpu.vector_store %arg3[%89, %c0_38], %88 {strides = array<i32>} : memref<16x32xf32, #tpu.memory_space<vmem>>, vector<1x32xf32>,
    %c10_i32 = arith.constant 10 : i32
    %91 = arith.addi %0, %c10_i32 : i32
    %92 = arith.index_cast %91 : i32 to index
    %93 = memref.load %arg1[%92] : memref<16xi32, #tpu.memory_space<smem>>
    %c0_i32_39 = arith.constant 0 : i32
    %94 = arith.maxsi %93, %c0_i32_39 : i32
    %c8_i32_40 = arith.constant 8 : i32
    %95 = arith.minsi %94, %c8_i32_40 : i32
    %96 = arith.index_cast %95 : i32 to index
    %c0_41 = arith.constant 0 : index
    %97 = vector.load %arg2[%96, %c0_41] : memref<9x32xf32, #tpu.memory_space<vmem>>, vector<1x32xf32>
    %98 = arith.index_cast %c10_i32 : i32 to index
    %c0_42 = arith.constant 0 : index
    %99 = vector.load %arg3[%98, %c0_42] : memref<16x32xf32, #tpu.memory_space<vmem>>, vector<1x32xf32>
    tpu.vector_store %arg3[%98, %c0_42], %97 {strides = array<i32>} : memref<16x32xf32, #tpu.memory_space<vmem>>, vector<1x32xf32>,
    %c11_i32 = arith.constant 11 : i32
    %100 = arith.addi %0, %c11_i32 : i32
    %101 = arith.index_cast %100 : i32 to index
    %102 = memref.load %arg1[%101] : memref<16xi32, #tpu.memory_space<smem>>
    %c0_i32_43 = arith.constant 0 : i32
    %103 = arith.maxsi %102, %c0_i32_43 : i32
    %c8_i32_44 = arith.constant 8 : i32
    %104 = arith.minsi %103, %c8_i32_44 : i32
    %105 = arith.index_cast %104 : i32 to index
    %c0_45 = arith.constant 0 : index
    %106 = vector.load %arg2[%105, %c0_45] : memref<9x32xf32, #tpu.memory_space<vmem>>, vector<1x32xf32>
    %107 = arith.index_cast %c11_i32 : i32 to index
    %c0_46 = arith.constant 0 : index
    %108 = vector.load %arg3[%107, %c0_46] : memref<16x32xf32, #tpu.memory_space<vmem>>, vector<1x32xf32>
    tpu.vector_store %arg3[%107, %c0_46], %106 {strides = array<i32>} : memref<16x32xf32, #tpu.memory_space<vmem>>, vector<1x32xf32>,
    %c12_i32 = arith.constant 12 : i32
    %109 = arith.addi %0, %c12_i32 : i32
    %110 = arith.index_cast %109 : i32 to index
    %111 = memref.load %arg1[%110] : memref<16xi32, #tpu.memory_space<smem>>
    %c0_i32_47 = arith.constant 0 : i32
    %112 = arith.maxsi %111, %c0_i32_47 : i32
    %c8_i32_48 = arith.constant 8 : i32
    %113 = arith.minsi %112, %c8_i32_48 : i32
    %114 = arith.index_cast %113 : i32 to index
    %c0_49 = arith.constant 0 : index
    %115 = vector.load %arg2[%114, %c0_49] : memref<9x32xf32, #tpu.memory_space<vmem>>, vector<1x32xf32>
    %116 = arith.index_cast %c12_i32 : i32 to index
    %c0_50 = arith.constant 0 : index
    %117 = vector.load %arg3[%116, %c0_50] : memref<16x32xf32, #tpu.memory_space<vmem>>, vector<1x32xf32>
    tpu.vector_store %arg3[%116, %c0_50], %115 {strides = array<i32>} : memref<16x32xf32, #tpu.memory_space<vmem>>, vector<1x32xf32>,
    %c13_i32 = arith.constant 13 : i32
    %118 = arith.addi %0, %c13_i32 : i32
    %119 = arith.index_cast %118 : i32 to index
    %120 = memref.load %arg1[%119] : memref<16xi32, #tpu.memory_space<smem>>
    %c0_i32_51 = arith.constant 0 : i32
    %121 = arith.maxsi %120, %c0_i32_51 : i32
    %c8_i32_52 = arith.constant 8 : i32
    %122 = arith.minsi %121, %c8_i32_52 : i32
    %123 = arith.index_cast %122 : i32 to index
    %c0_53 = arith.constant 0 : index
    %124 = vector.load %arg2[%123, %c0_53] : memref<9x32xf32, #tpu.memory_space<vmem>>, vector<1x32xf32>
    %125 = arith.index_cast %c13_i32 : i32 to index
    %c0_54 = arith.constant 0 : index
    %126 = vector.load %arg3[%125, %c0_54] : memref<16x32xf32, #tpu.memory_space<vmem>>, vector<1x32xf32>
    tpu.vector_store %arg3[%125, %c0_54], %124 {strides = array<i32>} : memref<16x32xf32, #tpu.memory_space<vmem>>, vector<1x32xf32>,
    %c14_i32 = arith.constant 14 : i32
    %127 = arith.addi %0, %c14_i32 : i32
    %128 = arith.index_cast %127 : i32 to index
    %129 = memref.load %arg1[%128] : memref<16xi32, #tpu.memory_space<smem>>
    %c0_i32_55 = arith.constant 0 : i32
    %130 = arith.maxsi %129, %c0_i32_55 : i32
    %c8_i32_56 = arith.constant 8 : i32
    %131 = arith.minsi %130, %c8_i32_56 : i32
    %132 = arith.index_cast %131 : i32 to index
    %c0_57 = arith.constant 0 : index
    %133 = vector.load %arg2[%132, %c0_57] : memref<9x32xf32, #tpu.memory_space<vmem>>, vector<1x32xf32>
    %134 = arith.index_cast %c14_i32 : i32 to index
    %c0_58 = arith.constant 0 : index
    %135 = vector.load %arg3[%134, %c0_58] : memref<16x32xf32, #tpu.memory_space<vmem>>, vector<1x32xf32>
    tpu.vector_store %arg3[%134, %c0_58], %133 {strides = array<i32>} : memref<16x32xf32, #tpu.memory_space<vmem>>, vector<1x32xf32>,
    %c15_i32 = arith.constant 15 : i32
    %136 = arith.addi %0, %c15_i32 : i32
    %137 = arith.index_cast %136 : i32 to index
    %138 = memref.load %arg1[%137] : memref<16xi32, #tpu.memory_space<smem>>
    %c0_i32_59 = arith.constant 0 : i32
    %139 = arith.maxsi %138, %c0_i32_59 : i32
    %c8_i32_60 = arith.constant 8 : i32
    %140 = arith.minsi %139, %c8_i32_60 : i32
    %141 = arith.index_cast %140 : i32 to index
    %c0_61 = arith.constant 0 : index
    %142 = vector.load %arg2[%141, %c0_61] : memref<9x32xf32, #tpu.memory_space<vmem>>, vector<1x32xf32>
    %143 = arith.index_cast %c15_i32 : i32 to index
    %c0_62 = arith.constant 0 : index
    %144 = vector.load %arg3[%143, %c0_62] : memref<16x32xf32, #tpu.memory_space<vmem>>, vector<1x32xf32>
    tpu.vector_store %arg3[%143, %c0_62], %142 {strides = array<i32>} : memref<16x32xf32, #tpu.memory_space<vmem>>, vector<1x32xf32>,
    %c16_i32_63 = arith.constant 16 : i32
    return
  }
  func.func @transform_0(%arg0: i32, %arg1: memref<16xi32, #tpu.memory_space<smem>>) -> (i32, i32) {
    %c0_i32 = arith.constant 0 : i32
    %c0_i32_0 = arith.constant 0 : i32
    %c0_i32_1 = arith.constant 0 : i32
    return %c0_i32, %c0_i32_0 : i32, i32
  }
  func.func @transform_1(%arg0: i32, %arg1: memref<16xi32, #tpu.memory_space<smem>>) -> (i32, i32) {
    %c0_i32 = arith.constant 0 : i32
    %c0_i32_0 = arith.constant 0 : i32
    return %arg0, %c0_i32 : i32, i32
  }
}

</mosaic_0001>

<bundles_post_ra>
// kernel: tpu_custom_call.1
= control target key start
LH: loop header
LB: loop body
LE: loop exit
PB: predicated region body
PF: predicated region fallthrough
CT: control target
= control target key end

     0   :  { %s412_s12 = smov [#allocation3]   ;;  %s486_s0 = inlined_call_operand.hbm [shape: s32[16], index: 0, kind: input, shape index: {}]   ;;  %s487_s1 = inlined_call_operand.hbm [shape: f32[9,32], index: 1, kind: input, shape index: {}]   ;;  %s488_s2 = inlined_call_operand.hbm [shape: f32[16,32], index: 2, kind: output, shape index: {}]  }
   0x1   :  { %s8_s11 = sshll.u32 %s486_s0, 4  ;;  %s9_s11 = int_to_ptr.hbm [resolvable:$true] %s8_s11 }
   0x2   :  { %11 = dma.hbm_to_smem %s9_s11, 16, %s412_s12, [#allocation2] }
   0x3   :  { %406 = dma.done.wait [#allocation2], 16 }
   0x4   :  { %407 = vsyncadd [#allocation2], 4294967280 }
   0x5   :  { %14 = sfence }
   0x6   :  { %15 = vsyncpa [#allocation5], 0 }
   0x7   :  { %16 = vsyncpa [#allocation6], 0  ;;  %s21_s15 = sshll.u32 %s487_s1, 4  ;;  %s413_s16 = smov [#allocation4]   ;;  %s22_s15 = int_to_ptr.hbm [resolvable:$true] %s21_s15 }
   0x8   :  { %s23_s17 = sshll.u32 %s413_s16, 4  ;;  %s414_s18 = smov 128   ;;  %s24_s17 = int_to_ptr.vmem [resolvable:$true] %s23_s17 }
   0x9   :  { %s415_s19 = smov 8  }
   0xa   :  { %29 = dma.hbm_to_vmem [thread:$0]  %s22_s15, 256, %s24_s17, [#allocation5], %s414_s18, %s414_s18, %s415_s19  }
   0xb   :  { %408 = dma.done.wait [#allocation5], 256  }
   0xc   :  { %409 = vsyncadd [#allocation5], 4294967040  ;;  %s35_s0 = sld [smem:[#allocation3]]  ;;  %vm42_vm0 = vcmask 253952  }
   0xd   :  { %s219_s20 = sld [smem:[#allocation3 + $0x1]] }
   0xe   :  { %s225_s21 = sld [smem:[#allocation3 + $0x2]] }
   0xf   :  { %s231_s22 = sld [smem:[#allocation3 + $0x3]] }
  0x10   :  { %s441_s23 = sld [smem:[#allocation3 + $0x4]] }
  0x11   :  { %s443_s24 = sld [smem:[#allocation3 + $0x5]] }
  0x12   :  { %p36_p0 = scmp.gt.s32.totalorder %s35_s0, 0  ;;  %p214_p1 = scmp.lt.s32.totalorder %s35_s0, 8 }
  0x13   :  { %p46_p2 = scmp.gt.s32.totalorder %s219_s20, 0  ;;  %p220_p3 = scmp.lt.s32.totalorder %s219_s20, 8 }
  0x14   :  { %s490_s0 = smov (!%p36_p0, %s35_s0), 0  ;;  %p55_p4 = scmp.gt.s32.totalorder %s225_s21, 0 }
  0x15   :  { %s492_s20 = smov (!%p46_p2, %s219_s20), 0  ;;  %s494_s0 = smov (!%p214_p1, %s490_s0), 8 }
  0x16   :  { %s496_s20 = smov (!%p220_p3, %s492_s20), 8  ;;  %s40_s1 = scalar_lea.vmem [#allocation4], %s494_s0 }
  0x17   :  { %v41_v0 = vld [vmem:[%s40_s1] sm:$0x1]  ;;  %p226_p5 = scmp.lt.s32.totalorder %s225_s21, 8  ;;  %s50_s25 = scalar_lea.vmem [#allocation4], %s496_s20 }
  0x18   :  { %43 = vst.msk [vmem:[#allocation7] sm:$0x1] %vm42_vm0, %v41_v0  ;;  %v51_v1 = vld [vmem:[%s50_s25] sm:$0x1]  ;;  %s498_s21 = smov (!%p55_p4, %s225_s21), 0  ;;  %p64_p6 = scmp.gt.s32.totalorder %s231_s22, 0 }
  0x19   :  { %52 = vst.msk [vmem:[#allocation7 + $0x1] sm:$0x1] %vm42_vm0, %v51_v1  ;;  %p232_p7 = scmp.lt.s32.totalorder %s231_s22, 8  ;;  %s500_s21 = smov (!%p226_p5, %s498_s21), 8 }
  0x1a   :  { %s502_s22 = smov (!%p64_p6, %s231_s22), 0  ;;  %p73_p8 = scmp.gt.s32.totalorder %s441_s23, 0 }
  0x1b   :  { %s59_s26 = scalar_lea.vmem [#allocation4], %s500_s21  ;;  %s504_s22 = smov (!%p232_p7, %s502_s22), 8 }
  0x1c   :  { %v60_v2 = vld [vmem:[%s59_s26] sm:$0x1]  ;;  %s74_s27 = scalar_select %p73_p8, %s441_s23, 0 }
  0x1d   :  { %61 = vst.msk [vmem:[#allocation7 + $0x2] sm:$0x1] %vm42_vm0, %v60_v2  ;;  %p238_p9 = scmp.lt.s32.totalorder %s441_s23, 8  ;;  %s68_s28 = scalar_lea.vmem [#allocation4], %s504_s22 }
  0x1e   :  { %v69_v3 = vld [vmem:[%s68_s28] sm:$0x1]  ;;  %p82_p10 = scmp.gt.s32.totalorder %s443_s24, 0  ;;  %p244_p11 = scmp.lt.s32.totalorder %s443_s24, 8 }
  0x1f   :  { %70 = vst.msk [vmem:[#allocation7 + $0x3] sm:$0x1] %vm42_vm0, %v69_v3  ;;  %s506_s27 = smov (!%p238_p9, %s74_s27), 8  ;;  %s249_s29 = sld [smem:[#allocation3 + $0x6]] }
  0x20   :  { %s508_s24 = smov (!%p82_p10, %s443_s24), 0  ;;  %s77_s30 = scalar_lea.vmem [#allocation4], %s506_s27 }
  0x21   :  { %v78_v4 = vld [vmem:[%s77_s30] sm:$0x1]  ;;  %s510_s24 = smov (!%p244_p11, %s508_s24), 8  ;;  %s255_s3 = sld [smem:[#allocation3 + $0x7]] }
  0x22   :  { %79 = vst.msk [vmem:[#allocation7 + $0x4] sm:$0x1] %vm42_vm0, %v78_v4  ;;  %s261_s4 = sld [smem:[#allocation3 + $0x8]]  ;;  %s86_s5 = scalar_lea.vmem [#allocation4], %s510_s24 }
  0x23   :  { %v87_v5 = vld [vmem:[%s86_s5] sm:$0x1]  ;;  %s267_s6 = sld [smem:[#allocation3 + $0x9]]  ;;  %s416_s22 = smov [#allocation7]  }
  0x24   :  { %88 = vst.msk [vmem:[#allocation7 + $0x5] sm:$0x1] %vm42_vm0, %v87_v5  ;;  %s457_s7 = sld [smem:[#allocation3 + $0xa]]  ;;  %s473_s23 = sshll.u32 %s416_s22, 4  ;;  %s184_s23 = int_to_ptr.vmem [resolvable:$true] %s473_s23 }
  0x25   :  { %p91_p12 = scmp.gt.s32.totalorder %s249_s29, 0  ;;  %p250_p13 = scmp.lt.s32.totalorder %s249_s29, 8 }
  0x26   :  { %s459_s8 = sld [smem:[#allocation3 + $0xb]]  ;;  %s185_s28 = sshll.u32 %s488_s2, 4  ;;  %s186_s28 = int_to_ptr.hbm [resolvable:$true] %s185_s28 }
  0x27   :  { %s512_s29 = smov (!%p91_p12, %s249_s29), 0  ;;  %p100_p0 = scmp.gt.s32.totalorder %s255_s3, 0 }
  0x28   :  { %p256_p1 = scmp.lt.s32.totalorder %s255_s3, 8  ;;  %s514_s29 = smov (!%p250_p13, %s512_s29), 8 }
  0x29   :  { %s516_s3 = smov (!%p100_p0, %s255_s3), 0  ;;  %p109_p2 = scmp.gt.s32.totalorder %s261_s4, 0 }
  0x2a   :  { %s95_s9 = scalar_lea.vmem [#allocation4], %s514_s29  ;;  %s518_s3 = smov (!%p256_p1, %s516_s3), 8 }
  0x2b   :  { %v96_v6 = vld [vmem:[%s95_s9] sm:$0x1]  ;;  %s110_s10 = scalar_select %p109_p2, %s261_s4, 0 }
  0x2c   :  { %97 = vst.msk [vmem:[#allocation7 + $0x6] sm:$0x1] %vm42_vm0, %v96_v6  ;;  %p262_p3 = scmp.lt.s32.totalorder %s261_s4, 8  ;;  %s104_s11 = scalar_lea.vmem [#allocation4], %s518_s3 }
  0x2d   :  { %v105_v7 = vld [vmem:[%s104_s11] sm:$0x1]  ;;  %p118_p4 = scmp.gt.s32.totalorder %s267_s6, 0  ;;  %p268_p5 = scmp.lt.s32.totalorder %s267_s6, 8 }
  0x2e   :  { %106 = vst.msk [vmem:[#allocation7 + $0x7] sm:$0x1] %vm42_vm0, %v105_v7  ;;  %s520_s10 = smov (!%p262_p3, %s110_s10), 8  ;;  %p127_p6 = scmp.gt.s32.totalorder %s457_s7, 0 }
  0x2f   :  { %s522_s6 = smov (!%p118_p4, %s267_s6), 0  ;;  %s113_s12 = scalar_lea.vmem [#allocation4], %s520_s10 }
  0x30   :  { %v114_v8 = vld [vmem:[%s113_s12] sm:$0x1]  ;;  %s524_s6 = smov (!%p268_p5, %s522_s6), 8  ;;  %p274_p7 = scmp.lt.s32.totalorder %s457_s7, 8 }
  0x31   :  { %115 = vst.msk [vmem:[#allocation7 + $0x8] sm:$0x1] %vm42_vm0, %v114_v8  ;;  %s128_s13 = scalar_select %p127_p6, %s457_s7, 0 }
  0x32   :  { %s122_s14 = scalar_lea.vmem [#allocation4], %s524_s6  ;;  %p136_p8 = scmp.gt.s32.totalorder %s459_s8, 0 }
  0x33   :  { %v123_v9 = vld [vmem:[%s122_s14] sm:$0x1]  ;;  %p280_p9 = scmp.lt.s32.totalorder %s459_s8, 8  ;;  %s526_s13 = smov (!%p274_p7, %s128_s13), 8 }
  0x34   :  { %124 = vst.msk [vmem:[#allocation7 + $0x9] sm:$0x1] %vm42_vm0, %v123_v9  ;;  %s528_s8 = smov (!%p136_p8, %s459_s8), 0  ;;  %s285_s15 = sld [smem:[#allocation3 + $0xc]] }
  0x35   :  { %s131_s16 = scalar_lea.vmem [#allocation4], %s526_s13  ;;  %s530_s8 = smov (!%p280_p9, %s528_s8), 8 }
  0x36   :  { %v132_v10 = vld [vmem:[%s131_s16] sm:$0x1]  ;;  %s291_s17 = sld [smem:[#allocation3 + $0xd]]  ;;  %s140_s0 = scalar_lea.vmem [#allocation4], %s530_s8 }
  0x37   :  { %133 = vst.msk [vmem:[#allocation7 + $0xa] sm:$0x1] %vm42_vm0, %v132_v10  ;;  %v141_v11 = vld [vmem:[%s140_s0] sm:$0x1]  ;;  %s297_s20 = sld [smem:[#allocation3 + $0xe]] }
  0x38   :  { %142 = vst.msk [vmem:[#allocation7 + $0xb] sm:$0x1] %vm42_vm0, %v141_v11  ;;  %s303_s21 = sld [smem:[#allocation3 + $0xf]] }
  0x3a   :  { %p145_p10 = scmp.gt.s32.totalorder %s285_s15, 0  ;;  %p286_p11 = scmp.lt.s32.totalorder %s285_s15, 8 }
  0x3c   :  { %s532_s15 = smov (!%p145_p10, %s285_s15), 0  ;;  %p154_p12 = scmp.gt.s32.totalorder %s291_s17, 0 }
  0x3d   :  { %p292_p13 = scmp.lt.s32.totalorder %s291_s17, 8  ;;  %s534_s15 = smov (!%p286_p11, %s532_s15), 8 }
  0x3e   :  { %s536_s17 = smov (!%p154_p12, %s291_s17), 0  ;;  %p163_p0 = scmp.gt.s32.totalorder %s297_s20, 0 }
  0x3f   :  { %s149_s24 = scalar_lea.vmem [#allocation4], %s534_s15  ;;  %s538_s17 = smov (!%p292_p13, %s536_s17), 8 }
  0x40   :  { %v150_v12 = vld [vmem:[%s149_s24] sm:$0x1]  ;;  %s164_s1 = scalar_select %p163_p0, %s297_s20, 0 }
  0x41   :  { %151 = vst.msk [vmem:[#allocation7 + $0xc] sm:$0x1] %vm42_vm0, %v150_v12  ;;  %p298_p1 = scmp.lt.s32.totalorder %s297_s20, 8  ;;  %s158_s25 = scalar_lea.vmem [#allocation4], %s538_s17 }
  0x42   :  { %v159_v13 = vld [vmem:[%s158_s25] sm:$0x1]  ;;  %p172_p2 = scmp.gt.s32.totalorder %s303_s21, 0  ;;  %p304_p3 = scmp.lt.s32.totalorder %s303_s21, 8 }
  0x43   :  { %160 = vst.msk [vmem:[#allocation7 + $0xd] sm:$0x1] %vm42_vm0, %v159_v13  ;;  %s540_s1 = smov (!%p298_p1, %s164_s1), 8 }
  0x44   :  { %s542_s21 = smov (!%p172_p2, %s303_s21), 0  ;;  %s167_s29 = scalar_lea.vmem [#allocation4], %s540_s1 }
  0x45   :  { %v168_v14 = vld [vmem:[%s167_s29] sm:$0x1]  ;;  %s544_s21 = smov (!%p304_p3, %s542_s21), 8 }
  0x46   :  { %169 = vst.msk [vmem:[#allocation7 + $0xe] sm:$0x1] %vm42_vm0, %v168_v14  ;;  %s176_s30 = scalar_lea.vmem [#allocation4], %s544_s21 }
  0x47   :  { %v177_v15 = vld [vmem:[%s176_s30] sm:$0x1] }
  0x48   :  { %178 = vst.msk [vmem:[#allocation7 + $0xf] sm:$0x1] %vm42_vm0, %v177_v15 }
  0x49   :  { %191 = dma.vmem_to_hbm [thread:$0]  %s184_s23, 256, %s186_s28, [#allocation6], %s414_s18, %s414_s18, %s415_s19  }
  0x4a   :  { %410 = dma.done.wait [#allocation6], 256  }
  0x4b   :  { %411 = vsyncadd [#allocation6], 4294967040 }
  0x4c   :  { %196 = vsyncpa [#allocation5], 1 }
  0x4d   :  { %197 = vsyncpa [#allocation6], 1 }

</bundles_post_ra>
